<compile_context>
chip_gen: v7x
topology: tpu7x:2x2x1
jax: 0.10.0
libtpu: 0.0.40
codegen_flags: <defaults>
</compile_context>

<pallas_src>
import functools

import jax
import jax.numpy as jnp
from jax import lax
from jax.experimental import pallas as pl
from jax.experimental.pallas import tpu as pltpu


def _round_up(x, m):
    return ((x + m - 1) // m) * m


def _tgcr_kernel(idx_ref, emb_ref, w1_ref, b1_ref, w2_ref, b2_ref, out_ref,
                 *, native_gather):
    c_pad = emb_ref.shape[0]
    ids = jnp.clip(idx_ref[...], 0, c_pad - 1)                    # (TB, 1) int32

    # --- embedding lookup: vectorized gather of TB rows ---------------------
    if native_gather:
        emb = jnp.take(emb_ref[...], ids[:, 0], axis=0, mode="clip")   # (TB, Fp)
    else:
        # exact one-hot MXU gather (fallback when gather lowering is missing)
        tb = ids.shape[0]
        onehot = (ids == lax.broadcasted_iota(jnp.int32, (tb, c_pad), 1)
                  ).astype(jnp.float32)                           # (TB, Cp)
        emb = jnp.dot(onehot, emb_ref[...],
                      preferred_element_type=jnp.float32)         # (TB, Fp)

    # --- middle: Linear(F -> H) + ReLU (bf16 MXU, f32 accumulate) -----------
    h = jnp.dot(emb.astype(jnp.bfloat16), w1_ref[...],
                preferred_element_type=jnp.float32) + b1_ref[...]
    h = jnp.maximum(h, 0.0)                                       # (TB, Hp) f32

    # --- fc: Linear(H -> F) (bf16 MXU, f32 accumulate) -----------------------
    out = jnp.dot(h.astype(jnp.bfloat16), w2_ref[...],
                  preferred_element_type=jnp.float32) + b2_ref[...]
    out_ref[...] = out.astype(out_ref.dtype)                      # (TB, Fp)


def pad_params(emb_table, w1, b1, w2, b2):
    """One-time padding of the module parameters (hoisted out of forward)."""
    C, F = emb_table.shape
    H = w1.shape[1]
    Fp = _round_up(F, 128)
    Hp = _round_up(H, 128)
    Cp = _round_up(C, 8)

    # zero padding keeps the padded math exactly equal to the unpadded math
    embp = jnp.zeros((Cp, Fp), jnp.float32).at[:C, :F].set(emb_table.astype(jnp.float32))
    w1p = jnp.zeros((Fp, Hp), jnp.bfloat16).at[:F, :H].set(w1.astype(jnp.bfloat16))
    b1p = jnp.zeros((1, Hp), jnp.float32).at[0, :H].set(b1.astype(jnp.float32))
    w2p = jnp.zeros((Hp, Fp), jnp.bfloat16).at[:H, :F].set(w2.astype(jnp.bfloat16))
    b2p = jnp.zeros((1, Fp), jnp.float32).at[0, :F].set(b2.astype(jnp.float32))
    return dict(emb=embp, w1=w1p, b1=b1p, w2=w2p, b2=b2p, F=F, H=H, C=C)


def tgcr_forward(class_id, params):
    """class_id: (B,) int; params from pad_params; returns (B, feature_dim) f32."""
    embp, w1p, b1p, w2p, b2p = (params["emb"], params["w1"], params["b1"],
                                params["w2"], params["b2"])
    F = params["F"]
    Cp, Fp = embp.shape
    Hp = w1p.shape[1]
    B = class_id.shape[0]

    # batch tile: big enough to amortize per-step overhead / feed the MXU,
    # split into >= 2 grid steps when possible so both v7x cores get work.
    Bp = _round_up(B, 8)
    TB = min(Bp, 256)
    Bp = _round_up(Bp, TB)
    if Bp // TB < 2 and Bp >= 16 and Bp % 16 == 0:
        TB = Bp // 2

    idx = jnp.zeros((Bp, 1), jnp.int32).at[:B, 0].set(class_id.astype(jnp.int32))
    grid = (Bp // TB,)

    # scheduling hints / explicit scoped-VMEM sizing
    flops = 2 * Bp * Fp * Hp * 2
    bytes_accessed = (embp.size * 4 + w1p.size * 2 + w2p.size * 2
                      + b1p.size * 4 + b2p.size * 4 + idx.size * 4 + Bp * Fp * 4)
    vmem_need = 2 * (Cp * Fp * 4 + Fp * Hp * 2 + Hp * Fp * 2
                     + 8 * Hp * 4 + 8 * Fp * 4 + TB * 128 * 4 + TB * Fp * 4)
    vmem_limit = int(min(max(vmem_need + (4 << 20), 16 << 20), 48 << 20))

    def _call(native_gather):
        kernel = functools.partial(_tgcr_kernel, native_gather=native_gather)
        return pl.pallas_call(
            kernel,
            out_shape=jax.ShapeDtypeStruct((Bp, Fp), jnp.float32),
            grid_spec=pltpu.PrefetchScalarGridSpec(
                num_scalar_prefetch=0,
                grid=grid,
                in_specs=[
                    pl.BlockSpec((TB, 1), lambda i: (i, 0)),    # class ids (per tile)
                    pl.BlockSpec((Cp, Fp), lambda i: (0, 0)),   # emb table (resident)
                    pl.BlockSpec((Fp, Hp), lambda i: (0, 0)),   # w1        (resident)
                    pl.BlockSpec((1, Hp), lambda i: (0, 0)),    # b1        (resident)
                    pl.BlockSpec((Hp, Fp), lambda i: (0, 0)),   # w2        (resident)
                    pl.BlockSpec((1, Fp), lambda i: (0, 0)),    # b2        (resident)
                ],
                out_specs=pl.BlockSpec((TB, Fp), lambda i: (i, 0)),
            ),
            compiler_params=pltpu.CompilerParams(
                dimension_semantics=("parallel",),
                vmem_limit_bytes=vmem_limit,
            ),
            cost_estimate=pl.CostEstimate(
                flops=flops, transcendentals=0, bytes_accessed=bytes_accessed),
        )(idx, embp, w1p, b1p, w2p, b2p)

    try:
        out = jax.block_until_ready(_call(native_gather=True))
    except Exception:
        # Mosaic version without native in-kernel gather lowering: use the
        # exact one-hot MXU gather path instead.
        out = _call(native_gather=False)

    return out[:B, :F]


def tgcr_reference(class_id, emb_table, w1, b1, w2, b2):
    emb = emb_table[class_id]
    h = jnp.maximum(emb @ w1 + b1, 0.0)
    return h @ w2 + b2


if __name__ == "__main__":
    num_classes = 10
    feature_dim = 32
    server_hidden_dim = 64
    batch = 8

    key = jax.random.PRNGKey(0)
    k_emb, k_w1, k_b1, k_w2, k_b2, k_idx = jax.random.split(key, 6)

    # nn.Embedding default init: N(0, 1)
    emb_table = jax.random.normal(k_emb, (num_classes, feature_dim), jnp.float32)

    # nn.Linear default init: U(-1/sqrt(fan_in), 1/sqrt(fan_in)); stored as (in, out)
    lim1 = 1.0 / jnp.sqrt(feature_dim * 1.0)
    w1 = jax.random.uniform(k_w1, (feature_dim, server_hidden_dim), jnp.float32, -lim1, lim1)
    b1 = jax.random.uniform(k_b1, (server_hidden_dim,), jnp.float32, -lim1, lim1)

    lim2 = 1.0 / jnp.sqrt(server_hidden_dim * 1.0)
    w2 = jax.random.uniform(k_w2, (server_hidden_dim, feature_dim), jnp.float32, -lim2, lim2)
    b2 = jax.random.uniform(k_b2, (feature_dim,), jnp.float32, -lim2, lim2)

    class_id = jax.random.randint(k_idx, (batch,), 0, num_classes, jnp.int32)

    params = pad_params(emb_table, w1, b1, w2, b2)   # one-time padding (hoisted)
    out = tgcr_forward(class_id, params)
    out = jax.block_until_ready(out)

    ref = tgcr_reference(class_id, emb_table, w1, b1, w2, b2)
    assert out.shape == (batch, feature_dim)
    # bf16 MXU operands with f32 accumulation -> bf16-appropriate tolerance
    assert jnp.allclose(out, ref, atol=5e-2, rtol=5e-2), "mismatch vs JAX reference"

    print("KERNEL_OK")
</pallas_src>

<mosaic_0001>
module attributes {stable_mosaic.version = 11 : i64} {
  func.func @_tgcr_kernel(%arg0: i32, %arg1: memref<8x1xi32, #tpu.memory_space<vmem>>, %arg2: memref<16x128xf32, #tpu.memory_space<vmem>>, %arg3: memref<128x128xbf16, #tpu.memory_space<vmem>>, %arg4: memref<1x128xf32, #tpu.memory_space<vmem>>, %arg5: memref<128x128xbf16, #tpu.memory_space<vmem>>, %arg6: memref<1x128xf32, #tpu.memory_space<vmem>>, %arg7: memref<8x128xf32, #tpu.memory_space<vmem>>) attributes {dimension_semantics = [#tpu.dimension_semantics<parallel>], iteration_bounds = array<i64: 1>, scalar_prefetch = 0 : i64, scratch_operands = 0 : i64, tpu.core_type = #tpu.core_type<tc>, window_params = [{transform_indices = @transform_0, window_bounds = array<i64: 8, 1>}, {pipeline_mode = #tpu.pipeline_mode<synchronous>, transform_indices = @transform_1, window_bounds = array<i64: 16, 128>}, {pipeline_mode = #tpu.pipeline_mode<synchronous>, transform_indices = @transform_2, window_bounds = array<i64: 128, 128>}, {pipeline_mode = #tpu.pipeline_mode<synchronous>, transform_indices = @transform_3, window_bounds = array<i64: 1, 128>}, {pipeline_mode = #tpu.pipeline_mode<synchronous>, transform_indices = @transform_4, window_bounds = array<i64: 128, 128>}, {pipeline_mode = #tpu.pipeline_mode<synchronous>, transform_indices = @transform_5, window_bounds = array<i64: 1, 128>}, {transform_indices = @transform_6, window_bounds = array<i64: 8, 128>}]} {
    %c0 = arith.constant 0 : index
    %c0_0 = arith.constant 0 : index
    %0 = vector.load %arg1[%c0, %c0_0] : memref<8x1xi32, #tpu.memory_space<vmem>>, vector<8x1xi32>
    %c0_i32 = arith.constant 0 : i32
    %c15_i32 = arith.constant 15 : i32
    %1 = vector.broadcast %c0_i32 : i32 to vector<8x1xi32>
    %2 = arith.maxsi %1, %0 : vector<8x1xi32>
    %3 = vector.broadcast %c15_i32 : i32 to vector<8x1xi32>
    %4 = arith.minsi %3, %2 : vector<8x1xi32>
    %5 = tpu.iota {dimensions = array<i32: 1>} : vector<8x16xi32>
    %6 = vector.broadcast %4 : vector<8x1xi32> to vector<8x16xi32>
    %7 = arith.cmpi eq, %6, %5 : vector<8x16xi32>
    %8 = arith.extui %7 : vector<8x16xi1> to vector<8x16xi32>
    %9 = arith.sitofp %8 : vector<8x16xi32> to vector<8x16xf32>
    %c0_1 = arith.constant 0 : index
    %c0_2 = arith.constant 0 : index
    %10 = vector.load %arg2[%c0_1, %c0_2] : memref<16x128xf32, #tpu.memory_space<vmem>>, vector<16x128xf32>
    %cst = arith.constant dense<0.000000e+00> : vector<8x128xf32>
    %11 = tpu.matmul %9, %10, %cst {dimension_numbers = #tpu.dot_dimension_numbers<[1], [0], [0], [1], [0, 0, 1, 1], [], []>} : vector<8x16xf32>, vector<16x128xf32>, vector<8x128xf32> -> vector<8x128xf32>
    %12 = arith.truncf %11 : vector<8x128xf32> to vector<8x128xbf16>
    %c0_3 = arith.constant 0 : index
    %c0_4 = arith.constant 0 : index
    %13 = vector.load %arg3[%c0_3, %c0_4] : memref<128x128xbf16, #tpu.memory_space<vmem>>, vector<128x128xbf16>
    %cst_5 = arith.constant dense<0.000000e+00> : vector<8x128xf32>
    %14 = tpu.matmul %12, %13, %cst_5 {dimension_numbers = #tpu.dot_dimension_numbers<[1], [0], [0], [1], [0, 0, 1, 1], [], []>} : vector<8x128xbf16>, vector<128x128xbf16>, vector<8x128xf32> -> vector<8x128xf32>
    %c0_6 = arith.constant 0 : index
    %c0_7 = arith.constant 0 : index
    %15 = vector.load %arg4[%c0_6, %c0_7] : memref<1x128xf32, #tpu.memory_space<vmem>>, vector<1x128xf32>
    %16 = vector.broadcast %15 : vector<1x128xf32> to vector<8x128xf32>
    %17 = arith.addf %14, %16 : vector<8x128xf32>
    %cst_8 = arith.constant 0.000000e+00 : f32
    %18 = vector.broadcast %cst_8 : f32 to vector<8x128xf32>
    %19 = arith.maximumf %17, %18 : vector<8x128xf32>
    %20 = arith.truncf %19 : vector<8x128xf32> to vector<8x128xbf16>
    %c0_9 = arith.constant 0 : index
    %c0_10 = arith.constant 0 : index
    %21 = vector.load %arg5[%c0_9, %c0_10] : memref<128x128xbf16, #tpu.memory_space<vmem>>, vector<128x128xbf16>
    %cst_11 = arith.constant dense<0.000000e+00> : vector<8x128xf32>
    %22 = tpu.matmul %20, %21, %cst_11 {dimension_numbers = #tpu.dot_dimension_numbers<[1], [0], [0], [1], [0, 0, 1, 1], [], []>} : vector<8x128xbf16>, vector<128x128xbf16>, vector<8x128xf32> -> vector<8x128xf32>
    %c0_12 = arith.constant 0 : index
    %c0_13 = arith.constant 0 : index
    %23 = vector.load %arg6[%c0_12, %c0_13] : memref<1x128xf32, #tpu.memory_space<vmem>>, vector<1x128xf32>
    %24 = vector.broadcast %23 : vector<1x128xf32> to vector<8x128xf32>
    %25 = arith.addf %22, %24 : vector<8x128xf32>
    %c0_14 = arith.constant 0 : index
    %c0_15 = arith.constant 0 : index
    %26 = vector.load %arg7[%c0_14, %c0_15] : memref<8x128xf32, #tpu.memory_space<vmem>>, vector<8x128xf32>
    tpu.vector_store %arg7[%c0_14, %c0_15], %25 {strides = array<i32>} : memref<8x128xf32, #tpu.memory_space<vmem>>, vector<8x128xf32>,
    return
  }
  func.func @transform_0(%arg0: i32) -> (i32, i32) {
    %c0_i32 = arith.constant 0 : i32
    %c0_i32_0 = arith.constant 0 : i32
    return %arg0, %c0_i32 : i32, i32
  }
  func.func @transform_1(%arg0: i32) -> (i32, i32) {
    %c0_i32 = arith.constant 0 : i32
    %c0_i32_0 = arith.constant 0 : i32
    %c0_i32_1 = arith.constant 0 : i32
    return %c0_i32, %c0_i32_0 : i32, i32
  }
  func.func @transform_2(%arg0: i32) -> (i32, i32) {
    %c0_i32 = arith.constant 0 : i32
    %c0_i32_0 = arith.constant 0 : i32
    %c0_i32_1 = arith.constant 0 : i32
    return %c0_i32, %c0_i32_0 : i32, i32
  }
  func.func @transform_3(%arg0: i32) -> (i32, i32) {
    %c0_i32 = arith.constant 0 : i32
    %c0_i32_0 = arith.constant 0 : i32
    %c0_i32_1 = arith.constant 0 : i32
    return %c0_i32, %c0_i32_0 : i32, i32
  }
  func.func @transform_4(%arg0: i32) -> (i32, i32) {
    %c0_i32 = arith.constant 0 : i32
    %c0_i32_0 = arith.constant 0 : i32
    %c0_i32_1 = arith.constant 0 : i32
    return %c0_i32, %c0_i32_0 : i32, i32
  }
  func.func @transform_5(%arg0: i32) -> (i32, i32) {
    %c0_i32 = arith.constant 0 : i32
    %c0_i32_0 = arith.constant 0 : i32
    %c0_i32_1 = arith.constant 0 : i32
    return %c0_i32, %c0_i32_0 : i32, i32
  }
  func.func @transform_6(%arg0: i32) -> (i32, i32) {
    %c0_i32 = arith.constant 0 : i32
    %c0_i32_0 = arith.constant 0 : i32
    return %arg0, %c0_i32 : i32, i32
  }
}

</mosaic_0001>

<bundles_post_ra>
// kernel: tpu_custom_call.1
= control target key start
LH: loop header
LB: loop body
LE: loop exit
PB: predicated region body
PF: predicated region fallthrough
CT: control target
= control target key end

     0   :  { %11 = vsyncpa [#allocation3], 0  ;;  %s744_s0 = inlined_call_operand.vmem [shape: s32[8,1], index: 0, kind: input, shape index: {}]   ;;  %s745_s1 = inlined_call_operand.hbm [shape: f32[16,128], index: 1, kind: input, shape index: {}]   ;;  %s746_s2 = inlined_call_operand.hbm [shape: bf16[128,128], index: 2, kind: input, shape index: {}]   ;;  %s747_s3 = inlined_call_operand.vmem [shape: f32[1,128], index: 3, kind: input, shape index: {}]   ;;  %s748_s4 = inlined_call_operand.hbm [shape: bf16[128,128], index: 4, kind: input, shape index: {}]   ;;  %s749_s5 = inlined_call_operand.vmem [shape: f32[1,128], index: 5, kind: input, shape index: {}]   ;;  %s750_s6 = inlined_call_operand.hbm [shape: f32[8,128], index: 6, kind: output, shape index: {}]  }
   0x1   :  { %12 = vsyncpa [#allocation6], 0 }
   0x2   :  { %13 = vsyncpa [#allocation4], 0  ;;  %s611_s21 = smov [#allocation5]   ;;  %s517_s25 = scalar_lea.hbm %s746_s2, 1024 }
   0x3   :  { %s33_s22 = sshll.u32 %s611_s21, 4  ;;  %p518_p0 = scmp.ne.s32.totalorder %s746_s2, %s517_s25  ;;  %s34_s22 = int_to_ptr.vmem [resolvable:$true] %s33_s22 }
   0x4   :  { %p521_p1 = scmp.lt.u32.totalorder %s517_s25, %s746_s2 }
   0x6   :  { %p523_p2 = pnand %p521_p1, %p518_p0 }
   0x8   :  { %526 = shalt.err (!%p523_p2)
}
   0x9   :  { %s527_s30 = scalar_lea.vmem %s34_s22, 1024  ;;  %p532_p4 = scmp.lt.s32.totalorder %s34_s22, %s34_s22 }
   0xa   :  { %p528_p3 = scmp.ne.s32.totalorder %s34_s22, %s527_s30  ;;  %p533_p5 = scmp.lt.s32.totalorder %s527_s30, %s527_s30 }
   0xc   :  { %p534_p6 = por %p533_p5, %p532_p4 }
   0xe   :  { %p535_p7 = pnand %p534_p6, %p528_p3 }
  0x10   :  { %538 = shalt.err (!%p535_p7)
}
  0x11   :  { %s612_s7 = smov 64   ;;  %s613_s8 = smov 4  }
  0x12   :  { %39 = dma.hbm_to_vmem [thread:$0]  %s746_s2, 1024, %s34_s22, [#allocation6], %s612_s7, %s612_s7, %s613_s8  }
  0x13   :  { %s614_s11 = smov [#allocation2]   ;;  %s539_s15 = scalar_lea.hbm %s745_s1, 256 }
  0x14   :  { %s21_s12 = sshll.u32 %s614_s11, 4  ;;  %p540_p8 = scmp.ne.s32.totalorder %s745_s1, %s539_s15  ;;  %s22_s12 = int_to_ptr.vmem [resolvable:$true] %s21_s12 }
  0x15   :  { %p543_p9 = scmp.lt.u32.totalorder %s539_s15, %s745_s1 }
  0x17   :  { %p545_p10 = pnand %p543_p9, %p540_p8 }
  0x19   :  { %548 = shalt.err (!%p545_p10)
}
  0x1a   :  { %s549_s20 = scalar_lea.vmem %s22_s12, 256  ;;  %p554_p12 = scmp.lt.s32.totalorder %s22_s12, %s22_s12 }
  0x1b   :  { %p550_p11 = scmp.ne.s32.totalorder %s22_s12, %s549_s20  ;;  %p555_p13 = scmp.lt.s32.totalorder %s549_s20, %s549_s20 }
  0x1d   :  { %p556_p0 = por %p555_p13, %p554_p12 }
  0x1f   :  { %p557_p1 = pnand %p556_p0, %p550_p11 }
  0x21   :  { %560 = shalt.err (!%p557_p1)
}
  0x22   :  { %s615_s2 = smov 128   ;;  %s616_s21 = smov 8  }
  0x23   :  { %27 = dma.hbm_to_vmem [thread:$0]  %s745_s1, 256, %s22_s12, [#allocation3], %s615_s2, %s615_s2, %s616_s21  }
  0x24   :  { %s617_s24 = smov [#allocation7]   ;;  %s561_s28 = scalar_lea.hbm %s748_s4, 1024 }
  0x25   :  { %s47_s25 = sshll.u32 %s617_s24, 4  ;;  %p562_p2 = scmp.ne.s32.totalorder %s748_s4, %s561_s28  ;;  %s48_s25 = int_to_ptr.vmem [resolvable:$true] %s47_s25 }
  0x26   :  { %p565_p3 = scmp.lt.u32.totalorder %s561_s28, %s748_s4 }
  0x28   :  { %p567_p4 = pnand %p565_p3, %p562_p2 }
  0x2a   :  { %570 = shalt.err (!%p567_p4)
}
  0x2b   :  { %s571_s11 = scalar_lea.vmem %s48_s25, 1024  ;;  %p576_p6 = scmp.lt.s32.totalorder %s48_s25, %s48_s25 }
  0x2c   :  { %p572_p5 = scmp.ne.s32.totalorder %s48_s25, %s571_s11  ;;  %p577_p7 = scmp.lt.s32.totalorder %s571_s11, %s571_s11 }
  0x2e   :  { %p578_p8 = por %p577_p7, %p576_p6 }
  0x30   :  { %p579_p9 = pnand %p578_p8, %p572_p5 }
  0x32   :  { %582 = shalt.err (!%p579_p9)
}
  0x33   :  { %53 = dma.hbm_to_vmem [thread:$0]  %s748_s4, 1024, %s48_s25, [#allocation6], %s612_s7, %s612_s7, %s613_s8  }
  0x34   :  { %605 = dma.done.wait [#allocation3], 256  }
  0x35   :  { %606 = vsyncadd [#allocation3], 4294967040 }
  0x36   :  { %607 = dma.done.wait [#allocation6], 2048  }
  0x37   :  { %608 = vsyncadd [#allocation6], 4294965248  ;;  %v618_v0 = vmov 0   ;;  %v619_v1 = vmov 0.0|0.0   ;;  %v620_v2 = vmov 0.0   ;;  %v66_v3 = vld [vmem:[%s744_s0] sm:$0xff]  ;;  %v71_v16 = vlaneseq }
  0x38   :  { %500 = vset.pattern.permute.xlu0 %v618_v0  ;;  %485 = vmatprep.subr.bf16.mxu0 %v619_v1  ;;  %v79_v4 = vld [vmem:[#allocation2] sm:$0xff]  ;;  %v80_v5 = vld [vmem:[#allocation2 + $0x8] sm:$0xff]  ;;  %vm67_vm0 = vcmp.gt.s32.totalorder %v66_v3, 0  ;;  %vm621_vm2 = vmmov 0   ;;  %v501_v9 = vld [vmem:[#allocation5] sm:$0xff]   ;;  %vm81_vm3 = vcmask 130048  }
  0x39   :  { %445 = vmatprep.subr.bf16.mxu1 %v620_v2  ;;  %v486_v6 = vpack.c.bf16 %v80_v5, %v79_v4  ;;  %v68_v7 = vsel %vm67_vm0, %v66_v3, 0  ;;  %442 = vmatprep.mubr.msk.f32.mxu0 %vm621_vm2, %v620_v2  ;;  %v502_v10 = vld [vmem:[#allocation5 + $0x8] sm:$0xff]   ;;  %v503_v11 = vld [vmem:[#allocation5 + $0x10] sm:$0xff]   ;;  %v504_v12 = vld [vmem:[#allocation5 + $0x18] sm:$0xff]   ;;  %v72_v17 = vand.u32 127, %v71_v16  ;;  %s622_s15 = smov [#allocation8]  }
  0x3a   :  { %vm69_vm1 = vcmp.lt.s32.totalorder %v68_v7, 15  ;;  %461 = vmatprep.mubr.msk.bf16.mxu1 %vm621_vm2, %v620_v2  ;;  %446 = vmatpush3.bf16.msra.mxu1 %v501_v9  ;;  %v505_v13 = vld [vmem:[#allocation5 + $0x20] sm:$0xff]   ;;  %v506_v14 = vld [vmem:[#allocation5 + $0x28] sm:$0xff]   ;;  %v507_v15 = vld [vmem:[#allocation5 + $0x30] sm:$0xff]   ;;  %s387_s16 = sshll.u32 %s622_s15, 4  ;;  %s388_s16 = int_to_ptr.vmem [resolvable:$true] %s387_s16 }
  0x3b   :  { %487 = vmatpush3.bf16.msra.mxu0 %v486_v6  ;;  %v70_v8 = vsel %vm69_vm1, %v68_v7, 15  ;;  %447 = vmatprep.subr.bf16.mxu1 %v620_v2  ;;  %v508_v20 = vld [vmem:[#allocation5 + $0x38] sm:$0xff]   ;;  %v509_v21 = vld [vmem:[#allocation7] sm:$0xff]   ;;  %v510_v22 = vld [vmem:[#allocation7 + $0x8] sm:$0xff]   ;;  %p588_p11 = scmp.lt.s32.totalorder %s388_s16, %s388_s16 }
  0x3c   :  { %465 = vmatprep.subr.bf16.mxu0 %v620_v2  ;;  %74 = vperm.xlu0 %500, %v70_v8   ;;  %v511_v23 = vld [vmem:[#allocation7 + $0x10] sm:$0xff]   ;;  %v512_v24 = vld [vmem:[#allocation7 + $0x18] sm:$0xff]   ;;  %v513_v25 = vld [vmem:[#allocation7 + $0x20] sm:$0xff]  }
  0x3d   :  { %v514_v26 = vld [vmem:[#allocation7 + $0x28] sm:$0xff]   ;;  %v515_v30 = vld [vmem:[#allocation7 + $0x30] sm:$0xff]   ;;  %v516_v31 = vld [vmem:[#allocation7 + $0x38] sm:$0xff]  }
  0x3e   :  { %448 = vmatpush3.bf16.msra.mxu1 %v502_v10  ;;  %v399_v32 = vld [vmem:[%s747_s3] ss:$0 sm:$0xff]  ;;  %s583_s3 = scalar_lea.vmem %s388_s16, 128 }
  0x3f   :  { %449 = vmatprep.subr.bf16.mxu1 %v620_v2  ;;  %v408_v40 = vld [vmem:[%s749_s5] ss:$0 sm:$0xff]  ;;  %p584_p10 = scmp.ne.s32.totalorder %s388_s16, %s583_s3  ;;  %p589_p12 = scmp.lt.s32.totalorder %s583_s3, %s583_s3 }
  0x41   :  { %p590_p13 = por %p589_p12, %p588_p11 }
  0x42   :  { %450 = vmatpush3.bf16.msra.mxu1 %v503_v11 }
  0x43   :  { %451 = vmatprep.subr.bf16.mxu1 %v620_v2  ;;  %p591_p0 = pnand %p590_p13, %p584_p10 }
  0x46   :  { %452 = vmatpush3.bf16.msra.mxu1 %v504_v12 }
  0x47   :  { %453 = vmatprep.subr.bf16.mxu1 %v620_v2 }
  0x4a   :  { %454 = vmatpush3.bf16.msra.mxu1 %v505_v13 }
  0x4b   :  { %455 = vmatprep.subr.bf16.mxu1 %v620_v2 }
  0x4e   :  { %456 = vmatpush3.bf16.msra.mxu1 %v506_v14 }
  0x4f   :  { %457 = vmatprep.subr.bf16.mxu1 %v620_v2 }
  0x52   :  { %458 = vmatpush3.bf16.msra.mxu1 %v507_v15 }
  0x53   :  { %459 = vmatprep.subr.bf16.mxu1 %v620_v2 }
  0x56   :  { %460 = vmatpush3.bf16.msra.mxu1 %v508_v20 }
  0xbb   :  { %v75_v18 = vpop.permute.xlu0 %74 }
  0xbc   :  { %vm76_vm4 = vcmp.eq.s32.totalorder %v75_v18, %v72_v17 }
  0xbd   :  { %v397_v19 = vsel %vm76_vm4, 1.0, %v620_v2 }
  0xbe   :  { %443 = vmatmul.mubr.msk.f32.vlgmr.msra.gmra.mrb[0].mxu0 %vm81_vm3, %v397_v19 }
  0xbf   :  { %481 = vmatprep.mubr.msk.bf16.mxu0 %vm621_vm2, %v620_v2  ;;  %466 = vmatpush3.bf16.msra.mxu0 %v509_v21 }
  0xc0   :  { %467 = vmatprep.subr.bf16.mxu0 %v620_v2 }
  0xc3   :  { %468 = vmatpush3.bf16.msra.mxu0 %v510_v22 }
  0xc4   :  { %469 = vmatprep.subr.bf16.mxu0 %v620_v2 }
  0xc7   :  { %470 = vmatpush3.bf16.msra.mxu0 %v511_v23 }
  0xc8   :  { %471 = vmatprep.subr.bf16.mxu0 %v620_v2 }
  0xcb   :  { %472 = vmatpush3.bf16.msra.mxu0 %v512_v24 }
  0xcc   :  { %473 = vmatprep.subr.bf16.mxu0 %v620_v2 }
  0xcf   :  { %474 = vmatpush3.bf16.msra.mxu0 %v513_v25 }
  0xd0   :  { %475 = vmatprep.subr.bf16.mxu0 %v620_v2 }
  0xd3   :  { %476 = vmatpush3.bf16.msra.mxu0 %v514_v26 }
  0xd4   :  { %477 = vmatprep.subr.bf16.mxu0 %v620_v2 }
  0xd7   :  { %478 = vmatpush3.bf16.msra.mxu0 %v515_v30 }
  0xd8   :  { %479 = vmatprep.subr.bf16.mxu0 %v620_v2 }
  0xdb   :  { %480 = vmatpush3.bf16.msra.mxu0 %v516_v31 }
 0x191   :  { %v151_v27 = vpop.f32.mrb[0].mxu0 }
 0x192   :  { %v155_v28 = vpack.c.bf16 %v151_v27, %v151_v27  ;;  %v444_v29 = vpop.f32.mrb[1].mxu0 }
 0x194   :  { %462 = vmatmul.mubr.bf16.vlgmr.msra.gmra.mrb[0].mxu1 %v155_v28 }
 0x267   :  { %v261_v33 = vpop.f32.mrb[0].mxu1 }
 0x268   :  { %v262_v34 = vadd.f32 %v399_v32, %v261_v33  ;;  %v463_v35 = vpop.f32.mrb[1].mxu1 }
 0x269   :  { %v264_v36 = vpop.f32.mrb[2].mxu1 }
 0x26a   :  { %v267_v37 = vmax.f32 %v262_v34, 0.0  ;;  %v464_v38 = vpop.f32.mrb[3].mxu1 }
 0x26c   :  { %v268_v39 = vpack.c.bf16 %v267_v37, %v267_v37 }
 0x26e   :  { %482 = vmatmul.mubr.bf16.vlgmr.msra.gmra.mrb[4].mxu0 %v268_v39 }
 0x341   :  { %v374_v41 = vpop.f32.mrb[4].mxu0 }
 0x342   :  { %v375_v42 = vadd.f32 %v408_v40, %v374_v41  ;;  %v483_v43 = vpop.f32.mrb[5].mxu0 }
 0x343   :  { %v377_v44 = vpop.f32.mrb[6].mxu0 }
 0x344   :  { %380 = vst [vmem:[#allocation8] sm:$0xff] %v375_v42  ;;  %v484_v45 = vpop.f32.mrb[7].mxu0 }
 0x345   :  { %594 = shalt.err (!%p591_p0)
}
 0x346   :  { %s595_s5 = scalar_lea.hbm %s750_s6, 128 }
 0x347   :  { %p596_p1 = scmp.ne.s32.totalorder %s750_s6, %s595_s5  ;;  %p599_p2 = scmp.lt.u32.totalorder %s595_s5, %s750_s6 }
 0x349   :  { %p601_p3 = pnand %p599_p2, %p596_p1 }
 0x34b   :  { %604 = shalt.err (!%p601_p3)
}
 0x34c   :  { %390 = dma.vmem_to_hbm [thread:$0]  %s388_s16, 128, %s750_s6, [#allocation4]  }
 0x34d   :  { %609 = dma.done.wait [#allocation4], 128  }
 0x34e   :  { %610 = vsyncadd [#allocation4], 4294967168 }
 0x34f   :  { %394 = vsyncpa [#allocation3], 1 }
 0x350   :  { %395 = vsyncpa [#allocation6], 1 }
 0x351   :  { %396 = vsyncpa [#allocation4], 1 }

</bundles_post_ra>
